<compile_context>
chip_gen: v6e
topology: v6e:2x2x1
jax: 0.10.0
libtpu: 0.0.40
codegen_flags: <defaults>
</compile_context>

<pallas_src>
import jax
import jax.numpy as jnp
from jax.experimental import pallas as pl
from jax.experimental.pallas import tpu as pltpu


def _gcne_block_kernel(a_ref, x_ref, deg_ref, w_ref, b_ref, o_ref, acc_ref, ax_ref):
    # a_ref:   [1, TN, TK] bf16  adjacency block (conv j, node-row tile i, col tile kk)
    # x_ref:   [TK, D]     bf16  node-feature block for contraction tile kk
    # deg_ref: [1, TN, 1]  f32   rowsum(A_j) for this node-row tile (precomputed)
    # w_ref:   [NC, D, D]  bf16  all conv weights, VMEM-resident
    # b_ref:   [NC, 1, D]  f32   all conv biases, VMEM-resident
    # o_ref:   [TN, D]           output tile (lane-dense, D on lanes)
    # acc_ref: [TN, D] f32       accumulator across the conv axis j
    # ax_ref:  [TN, D] f32       partial A_j @ x across the contraction axis kk
    j = pl.program_id(1)
    kk = pl.program_id(2)
    last_j = pl.num_programs(1) - 1
    last_k = pl.num_programs(2) - 1

    @pl.when(jnp.logical_and(j == 0, kk == 0))
    def _():
        acc_ref[...] = jnp.zeros_like(acc_ref)

    @pl.when(kk == 0)
    def _():
        ax_ref[...] = jnp.zeros_like(ax_ref)

    # Partial (A_j @ x) for this contraction tile -- bf16 MXU, f32 accumulate.
    ax_ref[...] += jnp.dot(a_ref[0], x_ref[...], preferred_element_type=jnp.float32)

    @pl.when(kk == last_k)
    def _():
        # A_j @ (x W_j + 1 b_j^T) == (A_j x) W_j + rowsum(A_j) * b_j
        h = jnp.dot(ax_ref[...].astype(jnp.bfloat16), w_ref[j],
                    preferred_element_type=jnp.float32)
        acc_ref[...] += h + deg_ref[0] * b_ref[j]

    @pl.when(jnp.logical_and(j == last_j, kk == last_k))
    def _():
        o_ref[...] = jnp.maximum(acc_ref[...], 0.0).astype(o_ref.dtype)


def _round_up(v, m):
    return ((v + m - 1) // m) * m


def dense_norm_adj(edge_index, num_nodes, *, normed=True):
    """Plain-JAX glue: edge list -> dense GCN-normalised adjacency (+ self loops)
    and its row sums (an O(E) segment sum, consumed by the in-kernel bias term).

    Matches GCNEConv: add_self_loops, deg = degree(col), deg^-0.5 (inf -> 0),
    norm = dis[row]*dis[col], messages x[row] aggregated (add) at col.
    """
    loop = jnp.arange(num_nodes, dtype=edge_index.dtype)
    row = jnp.concatenate([edge_index[0], loop])
    col = jnp.concatenate([edge_index[1], loop])
    deg = jnp.zeros((num_nodes,), jnp.float32).at[col].add(1.0)
    dis = jnp.where(deg > 0, jax.lax.rsqrt(deg), 0.0)
    vals = (dis[row] * dis[col]) if normed else jnp.ones(row.shape, jnp.float32)
    adj = jnp.zeros((num_nodes, num_nodes), jnp.float32).at[col, row].add(vals)
    rowsum = jnp.zeros((num_nodes,), jnp.float32).at[col].add(vals)
    return adj, rowsum


def gcne_block_forward(x, edge_indices, weights, biases, *, normed=True,
                       tile_n=512, tile_k=512):
    """x: [N, D] node features.
    edge_indices: list of k+1 int arrays [2, E_j] (edge_index, hop1..hopk),
                  already collated to global node ids.
    weights: [k+1, D, D] applied as h = x @ weights[j] (i.e. torch lin.weight.T),
             in the module's application order ([W0, W0, W1, ..., W_{k-1}]).
    biases:  [k+1, D]."""
    N, D = x.shape
    nconv = len(edge_indices)
    assert weights.shape == (nconv, D, D) and biases.shape == (nconv, D)
    out_dtype = x.dtype

    # --- glue: stacked dense normalised adjacencies + O(E) row sums ---
    adjs, rowsums = zip(*(dense_norm_adj(ei, N, normed=normed) for ei in edge_indices))
    adj = jnp.stack(adjs)                        # [nconv, N, N]
    deg = jnp.stack(rowsums)[..., None]          # [nconv, N, 1]

    # --- tiling ---
    # Node-row (sublane / output) tile; with tile_n=512 large graphs already
    # expose >=2 "parallel" tiles for the two v7x TensorCores.
    tn = min(tile_n, _round_up(N, 8))
    np_row = _round_up(N, tn)
    # Contraction (lane) tile: decoupled from tn; padded to >=256 so the MXU
    # contraction is not lane-starved for small graphs.
    tk = min(tile_k, _round_up(N, 256))
    np_k = _round_up(N, tk)

    # Ragged N handled by zero padding (padded rows/cols contribute exact zeros).
    adj = jnp.pad(adj, ((0, 0), (0, np_row - N), (0, np_k - N)))
    deg = jnp.pad(deg, ((0, 0), (0, np_row - N), (0, 0)))
    xk = jnp.pad(x, ((0, np_k - N), (0, 0)))

    # bf16 for the large streamed/resident matmul operands; f32 bias / rowsum.
    adj_bf = adj.astype(jnp.bfloat16)
    x_bf = xk.astype(jnp.bfloat16)
    w_bf = weights.astype(jnp.bfloat16)
    b3 = biases.reshape(nconv, 1, D).astype(jnp.float32)

    grid = (np_row // tn, nconv, np_k // tk)
    a_map = lambda i, j, kk: (j, i, kk)

    def _call(a_spec):
        return pl.pallas_call(
            _gcne_block_kernel,
            out_shape=jax.ShapeDtypeStruct((np_row, D), out_dtype),
            grid=grid,
            in_specs=[
                a_spec,                                                   # A_j tile
                pl.BlockSpec((tk, D), lambda i, j, kk: (kk, 0)),          # x tile
                pl.BlockSpec((1, tn, 1), lambda i, j, kk: (j, i, 0)),     # rowsum(A_j)
                pl.BlockSpec((nconv, D, D), lambda i, j, kk: (0, 0, 0)),  # W (resident)
                pl.BlockSpec((nconv, 1, D), lambda i, j, kk: (0, 0, 0)),  # b (resident)
            ],
            out_specs=pl.BlockSpec((tn, D), lambda i, j, kk: (i, 0)),
            scratch_shapes=[pltpu.VMEM((tn, D), jnp.float32),   # acc over convs
                            pltpu.VMEM((tn, D), jnp.float32)],  # partial A_j @ x
            compiler_params=pltpu.CompilerParams(
                dimension_semantics=("parallel", "arbitrary", "arbitrary"),
                vmem_limit_bytes=48 * 1024 * 1024),
        )(adj_bf, x_bf, deg, w_bf, b3)

    try:
        # Deeper (3-buffer) pipelining on the only large streamed operand (A).
        out = _call(pl.BlockSpec((1, tn, tk), a_map, pipeline_mode=pl.Buffered(3)))
    except Exception:
        # pipeline_mode / Buffered unsupported in this jax build: default 2-deep.
        out = _call(pl.BlockSpec((1, tn, tk), a_map))
    return out[:N]


if __name__ == "__main__":
    # Module defaults: dim=128, k=4, separate_hop_conv=True, combine='add',
    # normed=True, dropout evaluated in eval mode (identity).
    dim = 128
    k = 4
    N = 22            # ragged node count -> exercises zero padding
    E = 60

    key = jax.random.PRNGKey(0)
    keys = jax.random.split(key, 2 + k + 2 * k)

    x = jax.random.normal(keys[0], (N, dim), jnp.float32)
    edge_index = jax.random.randint(keys[1], (2, E), 0, N)
    hops = [jax.random.randint(keys[2 + i], (2, E), 0, N) for i in range(k)]
    edge_indices = [edge_index] + hops            # edge_index, hop1..hopk

    bound = 1.0 / (dim ** 0.5)   # PyTorch Linear default init range
    conv_w = [jax.random.uniform(keys[2 + k + i], (dim, dim), jnp.float32,
                                 minval=-bound, maxval=bound) for i in range(k)]
    conv_b = [jax.random.uniform(keys[2 + 2 * k + i], (dim,), jnp.float32,
                                 minval=-bound, maxval=bound) for i in range(k)]

    # GCNE_Block (separate_hop_conv=True) applies conv[0] to edge_index and
    # conv[i] to hop{i+1}: application order = [W0, W0, W1, ..., W_{k-1}].
    weights = jnp.stack([conv_w[0]] + conv_w)     # [k+1, dim, dim]
    biases = jnp.stack([conv_b[0]] + conv_b)      # [k+1, dim]

    out = gcne_block_forward(x, edge_indices, weights, biases)
    out = jax.block_until_ready(out)

    # Pure-JAX f32 reference of the PyTorch forward (combine='add', eval dropout).
    ref = jnp.zeros((N, dim), jnp.float32)
    for j, ei in enumerate(edge_indices):
        a, _ = dense_norm_adj(ei, N)
        ref = ref + a @ (x @ weights[j] + biases[j])
    ref = jnp.maximum(ref, 0.0)

    assert out.shape == (N, dim)
    # bf16 streamed operands vs f32 reference -> allow ~1e-2-level error.
    assert jnp.allclose(out, ref, atol=5e-2, rtol=5e-2), "mismatch vs reference"

    print("KERNEL_OK")
</pallas_src>

<mosaic_0001>
module attributes {stable_mosaic.version = 11 : i64} {
  func.func @_gcne_block_kernel(%arg0: i32, %arg1: i32, %arg2: i32, %arg3: memref<1x24x256xbf16, #tpu.memory_space<vmem>>, %arg4: memref<256x128xbf16, #tpu.memory_space<vmem>>, %arg5: memref<1x24x1xf32, #tpu.memory_space<vmem>>, %arg6: memref<5x128x128xbf16, #tpu.memory_space<vmem>>, %arg7: memref<5x1x128xf32, #tpu.memory_space<vmem>>, %arg8: memref<24x128xf32, #tpu.memory_space<vmem>>, %arg9: memref<24x128xf32, #tpu.memory_space<vmem>>, %arg10: memref<24x128xf32, #tpu.memory_space<vmem>>) attributes {dimension_semantics = [#tpu.dimension_semantics<parallel>, #tpu.dimension_semantics<arbitrary>, #tpu.dimension_semantics<arbitrary>], iteration_bounds = array<i64: 1, 5, 1>, scalar_prefetch = 0 : i64, scratch_operands = 2 : i64, tpu.core_type = #tpu.core_type<tc>, window_params = [{transform_indices = @transform_0, window_bounds = array<i64: 1, 24, 256>}, {transform_indices = @transform_1, window_bounds = array<i64: 256, 128>}, {transform_indices = @transform_2, window_bounds = array<i64: 1, 24, 1>}, {pipeline_mode = #tpu.pipeline_mode<synchronous>, transform_indices = @transform_3, window_bounds = array<i64: 5, 128, 128>}, {pipeline_mode = #tpu.pipeline_mode<synchronous>, transform_indices = @transform_4, window_bounds = array<i64: 5, 1, 128>}, {transform_indices = @transform_5, window_bounds = array<i64: 24, 128>}]} {
    %c0_i32 = arith.constant 0 : i32
    %0 = arith.cmpi eq, %arg1, %c0_i32 : i32
    %c0_i32_0 = arith.constant 0 : i32
    %1 = arith.cmpi eq, %arg2, %c0_i32_0 : i32
    %2 = arith.andi %0, %1 : i1
    %3 = arith.extui %2 : i1 to i32
    %c0_i32_1 = arith.constant 0 : i32
    %4 = arith.cmpi ne, %3, %c0_i32_1 : i32
    scf.if %4 {
      %cst_16 = arith.constant 0.000000e+00 : f32
      %23 = vector.broadcast %cst_16 : f32 to vector<24x128xf32>
      %c0_17 = arith.constant 0 : index
      %c0_18 = arith.constant 0 : index
      %24 = vector.load %arg9[%c0_17, %c0_18] : memref<24x128xf32, #tpu.memory_space<vmem>>, vector<24x128xf32>
      tpu.vector_store %arg9[%c0_17, %c0_18], %23 {strides = array<i32>} : memref<24x128xf32, #tpu.memory_space<vmem>>, vector<24x128xf32>,
    } else {
    }
    %c0_i32_2 = arith.constant 0 : i32
    %5 = arith.cmpi eq, %arg2, %c0_i32_2 : i32
    %6 = arith.extui %5 : i1 to i32
    %c0_i32_3 = arith.constant 0 : i32
    %7 = arith.cmpi ne, %6, %c0_i32_3 : i32
    scf.if %7 {
      %cst_16 = arith.constant 0.000000e+00 : f32
      %23 = vector.broadcast %cst_16 : f32 to vector<24x128xf32>
      %c0_17 = arith.constant 0 : index
      %c0_18 = arith.constant 0 : index
      %24 = vector.load %arg10[%c0_17, %c0_18] : memref<24x128xf32, #tpu.memory_space<vmem>>, vector<24x128xf32>
      tpu.vector_store %arg10[%c0_17, %c0_18], %23 {strides = array<i32>} : memref<24x128xf32, #tpu.memory_space<vmem>>, vector<24x128xf32>,
    } else {
    }
    %c0 = arith.constant 0 : index
    %c0_4 = arith.constant 0 : index
    %8 = vector.load %arg10[%c0, %c0_4] : memref<24x128xf32, #tpu.memory_space<vmem>>, vector<24x128xf32>
    %c0_5 = arith.constant 0 : index
    %c0_6 = arith.constant 0 : index
    %c0_7 = arith.constant 0 : index
    %9 = vector.load %arg3[%c0_5, %c0_6, %c0_7] : memref<1x24x256xbf16, #tpu.memory_space<vmem>>, vector<1x24x256xbf16>
    %10 = vector.shape_cast %9 : vector<1x24x256xbf16> to vector<24x256xbf16>
    %c0_8 = arith.constant 0 : index
    %c0_9 = arith.constant 0 : index
    %11 = vector.load %arg4[%c0_8, %c0_9] : memref<256x128xbf16, #tpu.memory_space<vmem>>, vector<256x128xbf16>
    %cst = arith.constant dense<0.000000e+00> : vector<24x128xf32>
    %12 = tpu.matmul %10, %11, %cst {dimension_numbers = #tpu.dot_dimension_numbers<[1], [0], [0], [1], [0, 0, 1, 1], [], []>} : vector<24x256xbf16>, vector<256x128xbf16>, vector<24x128xf32> -> vector<24x128xf32>
    %13 = arith.addf %8, %12 : vector<24x128xf32>
    %c0_10 = arith.constant 0 : index
    %c0_11 = arith.constant 0 : index
    %14 = vector.load %arg10[%c0_10, %c0_11] : memref<24x128xf32, #tpu.memory_space<vmem>>, vector<24x128xf32>
    tpu.vector_store %arg10[%c0_10, %c0_11], %13 {strides = array<i32>} : memref<24x128xf32, #tpu.memory_space<vmem>>, vector<24x128xf32>,
    %c0_i32_12 = arith.constant 0 : i32
    %15 = arith.cmpi eq, %arg2, %c0_i32_12 : i32
    %16 = arith.extui %15 : i1 to i32
    %c0_i32_13 = arith.constant 0 : i32
    %17 = arith.cmpi ne, %16, %c0_i32_13 : i32
    scf.if %17 {
      %c0_16 = arith.constant 0 : index
      %c0_17 = arith.constant 0 : index
      %23 = vector.load %arg10[%c0_16, %c0_17] : memref<24x128xf32, #tpu.memory_space<vmem>>, vector<24x128xf32>
      %24 = arith.truncf %23 : vector<24x128xf32> to vector<24x128xbf16>
      %25 = arith.index_cast %arg1 : i32 to index
      %c0_18 = arith.constant 0 : index
      %c0_19 = arith.constant 0 : index
      %26 = vector.load %arg6[%25, %c0_18, %c0_19] : memref<5x128x128xbf16, #tpu.memory_space<vmem>>, vector<1x128x128xbf16>
      %27 = vector.shape_cast %26 : vector<1x128x128xbf16> to vector<128x128xbf16>
      %cst_20 = arith.constant dense<0.000000e+00> : vector<24x128xf32>
      %28 = tpu.matmul %24, %27, %cst_20 {dimension_numbers = #tpu.dot_dimension_numbers<[1], [0], [0], [1], [0, 0, 1, 1], [], []>} : vector<24x128xbf16>, vector<128x128xbf16>, vector<24x128xf32> -> vector<24x128xf32>
      %c0_21 = arith.constant 0 : index
      %c0_22 = arith.constant 0 : index
      %29 = vector.load %arg9[%c0_21, %c0_22] : memref<24x128xf32, #tpu.memory_space<vmem>>, vector<24x128xf32>
      %c0_23 = arith.constant 0 : index
      %c0_24 = arith.constant 0 : index
      %c0_25 = arith.constant 0 : index
      %30 = vector.load %arg5[%c0_23, %c0_24, %c0_25] : memref<1x24x1xf32, #tpu.memory_space<vmem>>, vector<1x24x1xf32>
      %31 = vector.shape_cast %30 : vector<1x24x1xf32> to vector<24x1xf32>
      %32 = arith.index_cast %arg1 : i32 to index
      %c0_26 = arith.constant 0 : index
      %c0_27 = arith.constant 0 : index
      %33 = vector.load %arg7[%32, %c0_26, %c0_27] : memref<5x1x128xf32, #tpu.memory_space<vmem>>, vector<1x1x128xf32>
      %34 = vector.shape_cast %33 : vector<1x1x128xf32> to vector<1x128xf32>
      %35 = vector.broadcast %31 : vector<24x1xf32> to vector<24x128xf32>
      %36 = vector.broadcast %34 : vector<1x128xf32> to vector<24x128xf32>
      %37 = arith.mulf %35, %36 : vector<24x128xf32>
      %38 = arith.addf %28, %37 : vector<24x128xf32>
      %39 = arith.addf %29, %38 : vector<24x128xf32>
      %c0_28 = arith.constant 0 : index
      %c0_29 = arith.constant 0 : index
      %40 = vector.load %arg9[%c0_28, %c0_29] : memref<24x128xf32, #tpu.memory_space<vmem>>, vector<24x128xf32>
      tpu.vector_store %arg9[%c0_28, %c0_29], %39 {strides = array<i32>} : memref<24x128xf32, #tpu.memory_space<vmem>>, vector<24x128xf32>,
    } else {
    }
    %c4_i32 = arith.constant 4 : i32
    %18 = arith.cmpi eq, %arg1, %c4_i32 : i32
    %c0_i32_14 = arith.constant 0 : i32
    %19 = arith.cmpi eq, %arg2, %c0_i32_14 : i32
    %20 = arith.andi %18, %19 : i1
    %21 = arith.extui %20 : i1 to i32
    %c0_i32_15 = arith.constant 0 : i32
    %22 = arith.cmpi ne, %21, %c0_i32_15 : i32
    scf.if %22 {
      %c0_16 = arith.constant 0 : index
      %c0_17 = arith.constant 0 : index
      %23 = vector.load %arg9[%c0_16, %c0_17] : memref<24x128xf32, #tpu.memory_space<vmem>>, vector<24x128xf32>
      %cst_18 = arith.constant 0.000000e+00 : f32
      %24 = vector.broadcast %cst_18 : f32 to vector<24x128xf32>
      %25 = arith.maximumf %23, %24 : vector<24x128xf32>
      %c0_19 = arith.constant 0 : index
      %c0_20 = arith.constant 0 : index
      %26 = vector.load %arg8[%c0_19, %c0_20] : memref<24x128xf32, #tpu.memory_space<vmem>>, vector<24x128xf32>
      tpu.vector_store %arg8[%c0_19, %c0_20], %25 {strides = array<i32>} : memref<24x128xf32, #tpu.memory_space<vmem>>, vector<24x128xf32>,
    } else {
    }
    return
  }
  func.func @transform_0(%arg0: i32, %arg1: i32, %arg2: i32) -> (i32, i32, i32) {
    %c0_i32 = arith.constant 0 : i32
    return %arg1, %arg0, %arg2 : i32, i32, i32
  }
  func.func @transform_1(%arg0: i32, %arg1: i32, %arg2: i32) -> (i32, i32) {
    %c0_i32 = arith.constant 0 : i32
    %c0_i32_0 = arith.constant 0 : i32
    return %arg2, %c0_i32 : i32, i32
  }
  func.func @transform_2(%arg0: i32, %arg1: i32, %arg2: i32) -> (i32, i32, i32) {
    %c0_i32 = arith.constant 0 : i32
    %c0_i32_0 = arith.constant 0 : i32
    return %arg1, %arg0, %c0_i32 : i32, i32, i32
  }
  func.func @transform_3(%arg0: i32, %arg1: i32, %arg2: i32) -> (i32, i32, i32) {
    %c0_i32 = arith.constant 0 : i32
    %c0_i32_0 = arith.constant 0 : i32
    %c0_i32_1 = arith.constant 0 : i32
    %c0_i32_2 = arith.constant 0 : i32
    return %c0_i32, %c0_i32_0, %c0_i32_1 : i32, i32, i32
  }
  func.func @transform_4(%arg0: i32, %arg1: i32, %arg2: i32) -> (i32, i32, i32) {
    %c0_i32 = arith.constant 0 : i32
    %c0_i32_0 = arith.constant 0 : i32
    %c0_i32_1 = arith.constant 0 : i32
    %c0_i32_2 = arith.constant 0 : i32
    return %c0_i32, %c0_i32_0, %c0_i32_1 : i32, i32, i32
  }
  func.func @transform_5(%arg0: i32, %arg1: i32, %arg2: i32) -> (i32, i32) {
    %c0_i32 = arith.constant 0 : i32
    %c0_i32_0 = arith.constant 0 : i32
    return %arg0, %c0_i32 : i32, i32
  }
}

</mosaic_0001>

<bundles_post_ra>
// kernel: tpu_custom_call.1
= control target key start
LH: loop header
LB: loop body
LE: loop exit
PB: predicated region body
PF: predicated region fallthrough
CT: control target
= control target key end

     0   :  { %10 = vsyncpa [#allocation5], 0  ;;  %s1343_s0 = inlined_call_operand.vmem [shape: bf16[5,24,256], index: 0, kind: input, shape index: {}]   ;;  %s1344_s1 = inlined_call_operand.hbm [shape: bf16[256,128], index: 1, kind: input, shape index: {}]   ;;  %s1345_s2 = inlined_call_operand.vmem [shape: f32[5,24,1], index: 2, kind: input, shape index: {}]   ;;  %s1346_s3 = inlined_call_operand.hbm [shape: bf16[5,128,128], index: 3, kind: input, shape index: {}]   ;;  %s1347_s4 = inlined_call_operand.vmem [shape: f32[5,1,128], index: 4, kind: input, shape index: {}]   ;;  %s1348_s5 = inlined_call_operand.hbm [shape: f32[24,128], index: 5, kind: output, shape index: {}]  }
   0x1   :  { %11 = vsyncpa [#allocation8], 0 }
   0x2   :  { %12 = vsyncpa [#allocation6], 0  ;;  %s1213_s18 = smov 0   ;;  %s1215_s19 = smov 0  }
   0x3   :  { %s1217_s20 = smov 0  }
   0x4 LB: > { %s864_s21 = sadd.s32 4294967295, %s1172_s20   ;;  %s33_s22 = sadd.s32 1, %s1168_s19  ;;  %s1172_s20 = sphi %s1217_s20, %s18_s20   ;;  %s1168_s19 = sphi %s1215_s19, %s1354_s19   ;;  %s1164_s18 = sphi %s1213_s18, %s1353_s18  }
   0x5   : > { %p35_p0 = scmp.ge.s32.totalorder %s33_s22, 5  ;;  %p865_p1 = scmp.ge.s32.totalorder %s1172_s20, 1 }
   0x6   : > { %p194_p2 = scmp.lt.s32.totalorder %s1172_s20, 6  ;;  %p1240_p4 = scmp.eq.s32.totalorder %s864_s21, 0 }
   0x7   : > { %s1356_s22 = smov (%p35_p0, %s33_s22), 0  ;;  %s1174_s25 = smov [#allocation4]  }
   0x8   : > { %p1234_p3 = pnand %p865_p1, %p194_p2  ;;  %s209_s26 = sshll.u32 %s1174_s25, 4  ;;  %s210_s26 = int_to_ptr.vmem [resolvable:$true] %s209_s26 }
   0x9   : > { %s1175_s28 = smov [#allocation7]   ;;  %s1073_s30 = scalar_lea.vmem %s210_s26, 2048 }
   0xa   : > { %p985_p5 = pneg %p1234_p3  ;;  %s222_s29 = sshll.u32 %s1175_s28, 4  ;;  %s223_s29 = int_to_ptr.vmem [resolvable:$true] %s222_s29 }
   0xb   : > { %p1074_p8 = scmp.ne.s32.totalorder %s210_s26, %s1073_s30  ;;  %p1081_p11 = scmp.lt.s32.totalorder %s210_s26, %s210_s26 }
   0xc   : > { %p1248_p6 = pnand %p1240_p4, %p985_p5  ;;  %p1082_p12 = scmp.lt.s32.totalorder %s1073_s30, %s1073_s30 }
   0xe   : > { %p1064_p7 = pneg %p1248_p6  ;;  %p1083_p13 = por %p1082_p12, %p1081_p11 }
  0x10   : > { %p1076_p9 = pnand %p1074_p8, %p1064_p7 }
  0x12   : > { %p1077_p10 = pneg %p1076_p9 }
  0x14   : > { %p1084_p0 = pnand %p1083_p13, %p1077_p10 }
  0x16   : > { %1087 = shalt.err (!%p1084_p0)
}
  0x17   : > { %s1176_s6 = smov 64   ;;  %s1177_s7 = smov 4  }
  0x18   : > { %988 = dma.hbm_to_vmem [thread:$0]  (!%p1248_p6), %s1344_s1, 2048, %s210_s26, [#allocation5], %s1176_s6, %s1176_s6, %s1177_s7  }
  0x19   : > { %s1099_s10 = scalar_lea.vmem %s223_s29, 5120  ;;  %p1107_p8 = scmp.lt.s32.totalorder %s223_s29, %s223_s29 }
  0x1a   : > { %p1100_p1 = scmp.ne.s32.totalorder %s223_s29, %s1099_s10  ;;  %p1108_p9 = scmp.lt.s32.totalorder %s1099_s10, %s1099_s10 }
  0x1c   : > { %p1102_p2 = pnand %p1100_p1, %p1064_p7  ;;  %p1109_p11 = por %p1108_p9, %p1107_p8 }
  0x1e   : > { %p1103_p5 = pneg %p1102_p2 }
  0x20   : > { %p1110_p10 = pnand %p1109_p11, %p1103_p5 }
  0x22   : > { %1113 = shalt.err (!%p1110_p10)
}
  0x23   : > { %991 = dma.hbm_to_vmem [thread:$0]  (!%p1248_p6), %s1346_s3, 5120, %s223_s29, [#allocation8], %s1176_s6, %s1176_s6, %s1177_s7  }
  0x24   : > { %273 = sbr.rel (%p1234_p3) target bundleno = 522 (0x20a), region = 40 }
  0x29   : > { %1151 = dma.done.wait (%p1240_p4), [#allocation5], 2048  }
  0x2a   : > { %1153 = vsyncadd (%p1240_p4), [#allocation5], 4294965248 }
  0x2b   : > { %1155 = dma.done.wait (%p1240_p4), [#allocation8], 5120  }
  0x2c   : > { %1157 = vsyncadd (%p1240_p4), [#allocation8], 4294962176  ;;  %p320_p7 = scmp.lt.s32.totalorder %s1164_s18, 4  ;;  %p347_p6 = scmp.eq.s32.totalorder %s1164_s18, 0 }
  0x2d   : > { %v1178_v0 = vmov (%p347_p6), 0.0  }
  0x2e   : > { %s321_s13 = scalar_select %p320_p7, %s1164_s18, 4  ;;  %353 = vst [vmem:[#allocation2 + $0x10] sm:$0xff] (%p347_p6), %v1178_v0  ;;  %354 = vst [vmem:[#allocation2] sm:$0xff] (%p347_p6), %v1178_v0 }
  0x2f   : > { %352 = sbr.rel (!%p347_p6) target bundleno = 52 (0x34), region = 52  ;;  %355 = vst [vmem:[#allocation2 + $0x8] sm:$0xff] (%p347_p6), %v1178_v0 }
  0x30   : > { %s972_s14 = smul.u32 24, %s321_s13 }
  0x32   : > { %s1286_s17 = scalar_lea.vmem %s1343_s0, %s972_s14  ;;  %s1291_s26 = scalar_lea.vmem %s1345_s2, %s972_s14 }
  0x34 PF: > { %v1033_v1 = vld [vmem:[#allocation4 + $0x78] sm:$0xff]   ;;  %v1035_v3 = vld [vmem:[#allocation4 + $0x70] sm:$0xff]   ;;  %v1037_v5 = vld [vmem:[#allocation4 + $0x68] sm:$0xff]   ;;  %s912_s24 = sshll.u32 %s1164_s18, 6  ;;  %v1179_v32 = vmov 0   ;;  %p728_p3 = scmp.eq.s32.totalorder %s1164_s18, 4 }
  0x35   : > { %v1034_v2 = vld [vmem:[#allocation4 + $0x38] sm:$0xff]   ;;  %914 = vmatprep.subr.bf16.mxu0 %v1033_v1  ;;  %v1036_v4 = vld [vmem:[#allocation4 + $0x30] sm:$0xff]   ;;  %v1038_v6 = vld [vmem:[#allocation4 + $0x28] sm:$0xff]   ;;  %s1295_s27 = scalar_lea.vmem [#allocation7], %s912_s24  ;;  %1031 = vset.pattern.permute.xlu0 %v1179_v32  ;;  %s600_s30 = scalar_lea.vmem %s1347_s4, %s1164_s18 }
  0x36   : > { %915 = vmatpush3.bf16.msra.mxu0 %v1034_v2  ;;  %v1039_v7 = vld [vmem:[#allocation4 + $0x60] sm:$0xff]   ;;  %v1041_v9 = vld [vmem:[#allocation4 + $0x58] sm:$0xff]   ;;  %v1043_v11 = vld [vmem:[#allocation4 + $0x50] sm:$0xff]   ;;  %1032 = vset.pattern.permute.xlu1 %v1179_v32 }
  0x37   : > { %916 = vmatprep.subr.bf16.mxu0 %v1035_v3  ;;  %v1040_v8 = vld [vmem:[#allocation4 + $0x20] sm:$0xff]   ;;  %v1042_v10 = vld [vmem:[#allocation4 + $0x18] sm:$0xff]   ;;  %v1044_v12 = vld [vmem:[#allocation4 + $0x10] sm:$0xff]  }
  0x38   : > { %v1051_v13 = vld [vmem:[%s1286_s17 + $0x4] ss:$8 sps:$4 sm:$0xff]   ;;  %v1054_v14 = vld [vmem:[%s1295_s27 + $0x38] sm:$0xff]   ;;  %v1055_v15 = vld [vmem:[%s1295_s27 + $0x30] sm:$0xff]  }
  0x39   : > { %545 = vmatprep.mubr.bf16.mxu0 %v1051_v13  ;;  %v1045_v16 = vld [vmem:[#allocation4 + $0x48] sm:$0xff]   ;;  %952 = vmatprep.subr.bf16.mxu1 %v1054_v14  ;;  %v1056_v18 = vld [vmem:[%s1295_s27 + $0x28] sm:$0xff]   ;;  %v1047_v19 = vld [vmem:[#allocation4 + $0x40] sm:$0xff]  }
  0x3a   : > { %917 = vmatpush3.bf16.msra.mxu0 %v1036_v4  ;;  %v1046_v17 = vld [vmem:[#allocation4 + $0x8] sm:$0xff]   ;;  %953 = vmatpush3.bf16.msra.mxu1 %v1054_v14  ;;  %v1048_v21 = vld [vmem:[#allocation4] sm:$0xff]   ;;  %v367_v22 = vld [vmem:[%s1286_s17 + $0x10] sm:$0xff] }
  0x3b   : > { %918 = vmatprep.subr.bf16.mxu0 %v1037_v5  ;;  %954 = vmatprep.subr.bf16.mxu1 %v1055_v15  ;;  %v1057_v20 = vld [vmem:[%s1295_s27 + $0x20] sm:$0xff]   ;;  %v1058_v24 = vld [vmem:[%s1295_s27 + $0x18] sm:$0xff]   ;;  %v878_v25 = vcombine.high %v367_v22, %v367_v22  ;;  %v877_v26 = vcombine.low %v367_v22, %v367_v22  ;;  %v1059_v27 = vld [vmem:[%s1295_s27 + $0x10] sm:$0xff]  }
  0x3c   : > { %v1049_v23 = vld [vmem:[%s1286_s17] ss:$8 sps:$4 sm:$0xff]   ;;  %v599_v31 = vld [vmem:[%s1291_s26 + $0x10] sm:$0xff] }
  0x3d   : > { %v1060_v28 = vld [vmem:[%s1295_s27 + $0x8] sm:$0xff]   ;;  %v1061_v29 = vld [vmem:[%s1295_s27] sm:$0xff]   ;;  %614 = vperm.xlu1 %1032, %v599_v31   ;;  %v594_v56 = vld [vmem:[#allocation2 + $0x10] sm:$0xff] }
  0x3e   : > { %919 = vmatpush3.bf16.msra.mxu0 %v1038_v6  ;;  %955 = vmatpush3.bf16.msra.mxu1 %v1055_v15  ;;  %v597_v30 = vld [vmem:[%s1291_s26] sm:$0xff]  ;;  %v598_v33 = vld [vmem:[%s1291_s26 + $0x8] sm:$0xff] }
  0x3f   : > { %920 = vmatprep.subr.bf16.mxu0 %v1039_v7  ;;  %956 = vmatprep.subr.bf16.mxu1 %v1056_v18  ;;  %v897_v47 = vld [vmem:[%s600_s30] ss:$0 sm:$0xff]  ;;  %v596_v52 = vld [vmem:[#allocation2 + $0x8] sm:$0xff] }
  0x40   : > { %604 = vperm.xlu0 %1031, %v597_v30   ;;  %v595_v63 = vld [vmem:[#allocation2] sm:$0xff] }
  0x42   : > { %921 = vmatpush3.bf16.msra.mxu0 %v1040_v8  ;;  %957 = vmatpush3.bf16.msra.mxu1 %v1056_v18 }
  0x43   : > { %922 = vmatprep.subr.bf16.mxu0 %v1041_v9  ;;  %958 = vmatprep.subr.bf16.mxu1 %v1057_v20 }
  0x44   : > { %609 = vperm.xlu0 %1031, %v598_v33  }
  0x46   : > { %923 = vmatpush3.bf16.msra.mxu0 %v1042_v10  ;;  %959 = vmatpush3.bf16.msra.mxu1 %v1057_v20 }
  0x47   : > { %924 = vmatprep.subr.bf16.mxu0 %v1043_v11  ;;  %960 = vmatprep.subr.bf16.mxu1 %v1058_v24 }
  0x4a   : > { %925 = vmatpush3.bf16.msra.mxu0 %v1044_v12  ;;  %961 = vmatpush3.bf16.msra.mxu1 %v1058_v24 }
  0x4b   : > { %926 = vmatprep.subr.bf16.mxu0 %v1045_v16  ;;  %962 = vmatprep.subr.bf16.mxu1 %v1059_v27 }
  0x4e   : > { %927 = vmatpush3.bf16.msra.mxu0 %v1046_v17  ;;  %963 = vmatpush3.bf16.msra.mxu1 %v1059_v27 }
  0x4f   : > { %928 = vmatprep.subr.bf16.mxu0 %v1047_v19  ;;  %964 = vmatprep.subr.bf16.mxu1 %v1060_v28 }
  0x52   : > { %929 = vmatpush3.bf16.msra.mxu0 %v1048_v21  ;;  %965 = vmatpush3.bf16.msra.mxu1 %v1060_v28 }
  0x53   : > { %966 = vmatprep.subr.bf16.mxu1 %v1061_v29 }
  0x55   : > { %546 = vmatmul.mubr.bf16.vlgmr.msra.gmra.mxu0 %v1049_v23 }
  0x56   : > { %553 = vmatprep.mubr.bf16.mxu0 %v878_v25  ;;  %967 = vmatpush3.bf16.msra.mxu1 %v1061_v29 }
  0x5d   : > { %554 = vmatmul.mubr.bf16.gmra.mxu0 %v877_v26 }
  0xb8   : > { %v615_v48 = vpop.permute.xlu1 %614 }
  0xb9   : > { %v625_v50 = vmul.f32 %v897_v47, %v615_v48 }
  0xbb   : > { %v605_v49 = vpop.permute.xlu0 %604 }
  0xbc   : > { %v623_v51 = vmul.f32 %v897_v47, %v605_v49 }
  0xbf   : > { %v610_v55 = vpop.permute.xlu0 %609 }
  0xc0   : > { %v624_v61 = vmul.f32 %v897_v47, %v610_v55 }
 0x115   : > { %v930_v34 = vpop.f32.mrf.mxu0 }
 0x117   : > { %v931_v35 = vpop.f32.mrf.mxu0 }
 0x118   : > { %v932_v38 = vadd.f32 %v931_v35, %v930_v34 }
 0x119   : > { %v933_v36 = vpop.f32.mrf.mxu0 }
 0x11b   : > { %v934_v37 = vpop.f32.mrf.mxu0 }
 0x11c   : > { %v935_v39 = vadd.f32 %v934_v37, %v933_v36 }
 0x11d   : > { %v936_v40 = vpop.f32.mrf.mxu0 }
 0x11e   : > { %v573_v41 = vpack.c.bf16 %v935_v39, %v932_v38 }
 0x11f   : > { %v937_v42 = vpop.f32.mrf.mxu0 }
 0x120   : > { %v938_v43 = vadd.f32 %v937_v42, %v936_v40  ;;  %968 = vmatprep.mubr.bf16.mxu1 %v573_v41 }
 0x121   : > { %v939_v44 = vpop.f32.mrf.mxu0 }
 0x122   : > { %v574_v45 = vpack.c.bf16 %v938_v43, %v938_v43 }
 0x123   : > { %v940_v46 = vpop.f32.mrf.mxu0 }
 0x124   : > { %969 = vmatmul.mubr.bf16.vlgmr.msra.gmra.mxu1 %v574_v45 }
 0x1e4   : > { %v970_v53 = vpop.f32.mrf.mxu1 }
 0x1e5   : > { %v717_v54 = vadd.f32 %v970_v53, %v625_v50 }
 0x1e6   : > { %v708_v57 = vpop.f32.mrf.mxu1 }
 0x1e7   : > { %v724_v58 = vadd.f32 %v717_v54, %v596_v52  ;;  %v709_v59 = vadd.f32 %v708_v57, %v623_v51 }
 0x1e8   : > { %v971_v60 = vpop.f32.mrf.mxu1 }
 0x1e9   : > { %727 = vst [vmem:[#allocation2 + $0x8] sm:$0xff] %v724_v58  ;;  %v722_v62 = vadd.f32 %v709_v59, %v594_v56 }
 0x1ea   : > { %v711_v0 = vpop.f32.mrf.mxu1 }
 0x1eb   : > { %725 = vst [vmem:[#allocation2 + $0x10] sm:$0xff] %v722_v62  ;;  %v712_v1 = vadd.f32 %v711_v0, %v624_v61  ;;  %732 = sbr.rel (!%p728_p3) target bundleno = 506 (0x1fa), region = 64 }
 0x1ed   : > { %v723_v2 = vadd.f32 %v712_v1, %v595_v63 }
 0x1ef   : > { %726 = vst [vmem:[#allocation2] sm:$0xff] %v723_v2 }
 0x1f0   : > { %v735_v5 = vld [vmem:[#allocation2 + $0x8] sm:$0xff] }
 0x1f1   : > { %v738_v8 = vmax.f32 %v735_v5, 0.0 }
 0x1f2   : > { %v733_v3 = vld [vmem:[#allocation2 + $0x10] sm:$0xff] }
 0x1f3   : > { %v736_v6 = vmax.f32 %v733_v3, 0.0  ;;  %741 = vst [vmem:[#allocation9 + $0x10] sm:$0xff] %v738_v8 }
 0x1f5   : > { %739 = vst [vmem:[#allocation9] sm:$0xff] %v736_v6 }
 0x1f6   : > { %v734_v4 = vld [vmem:[#allocation2] sm:$0xff] }
 0x1f7   : > { %v737_v7 = vmax.f32 %v734_v4, 0.0 }
 0x1f9   : > { %740 = vst [vmem:[#allocation9 + $0x8] sm:$0xff] %v737_v7 }
 0x1fa PF: > { %p1319_p4 = scmp.eq.s32.totalorder %s864_s21, 4  ;;  %s1180_s7 = smov [#allocation9]  }
 0x1fb   : > { %s751_s18 = sshll.u32 %s1180_s7, 4  ;;  %s752_s18 = int_to_ptr.vmem [resolvable:$true] %s751_s18 }
 0x1fc   : > { %s1114_s8 = scalar_lea.vmem %s752_s18, 384  ;;  %p1121_p1 = scmp.lt.s32.totalorder %s752_s18, %s752_s18 }
 0x1fd   : > { %p1115_p12 = scmp.ne.s32.totalorder %s752_s18, %s1114_s8  ;;  %p1122_p2 = scmp.lt.s32.totalorder %s1114_s8, %s1114_s8 }
 0x1ff   : > { %p1116_p13 = pnand %p1115_p12, %p1319_p4  ;;  %p1123_p5 = por %p1122_p2, %p1121_p1 }
 0x201   : > { %p1117_p0 = pneg %p1116_p13 }
 0x203   : > { %p1124_p8 = pnand %p1123_p5, %p1117_p0 }
 0x205   : > { %1127 = shalt.err (!%p1124_p8)
}
 0x206   : > { %s1181_s9 = smov 128   ;;  %s1182_s21 = smov 8  }
 0x207   : > { %982 = dma.vmem_to_hbm [thread:$0]  (%p1319_p4), %s752_s18, 384, %s1348_s5, [#allocation6], %s1181_s9, %s1181_s9, %s1182_s21  }
 0x208   : > { %1159 = dma.done.wait (%p1319_p4), [#allocation6], 384  }
 0x209   : > { %1161 = vsyncadd (%p1319_p4), [#allocation6], 4294966912 }
 0x20a PF: > { %s18_s20 = sadd.s32 1, %s1172_s20   ;;  %s1353_s18 = smov %s1168_s19 }
 0x20b   : > { %p15_p9 = scmp.ge.s32.totalorder %s18_s20, 7   ;;  %s1354_s19 = smov %s1356_s22 }
 0x20d   :  { %17 = sbr.rel (!%p15_p9) target bundleno = 4 (0x4), region = 99 }
 0x212   :  { %767 = vsyncpa [#allocation5], 1 }
 0x213   :  { %769 = vsyncpa [#allocation5 + $0x1], 1 }
 0x214   :  { %770 = vsyncpa [#allocation8], 1 }
 0x215   :  { %771 = vsyncpa [#allocation6], 1 }
 0x216   :  { %773 = vsyncpa [#allocation6 + $0x1], 1 }

</bundles_post_ra>
